<compile_context>
chip_gen: v7x
topology: tpu7x:2x2x1
jax: 0.10.0
libtpu: 0.0.40
codegen_flags: <defaults>
</compile_context>

<pallas_src>
import functools

import jax
import jax.numpy as jnp
from jax.experimental import pallas as pl
from jax.experimental.pallas import tpu as pltpu


def _round_up(x, m):
    return ((x + m - 1) // m) * m


def _vmem_capacity_bytes():
    """Per-core VMEM capacity in bytes; conservative fallback if query fails."""
    cap = None
    try:
        info = pltpu.get_tpu_info()
        cap = getattr(info, "vmem_capacity_bytes", None)
    except Exception:
        cap = None
    if not cap:
        cap = 64 * 1024 * 1024  # conservative: v7x per-TensorCore VMEM
    return int(min(max(int(cap), 32 * 1024 * 1024), 128 * 1024 * 1024))


# ----------------------------------------------------------------------------
# Kernels.  W is pre-transposed to (K, N) at init, so every dot below is the
# canonical (tm,tk)x(tk,tn) MXU matmul (no trans-B, no per-tile transpose).
# ----------------------------------------------------------------------------
def _linear_kernel_single_k(x_ref, w_ref, b_ref, o_ref, *, compute_dtype):
    """K collapsed into one tile: single matmul + bias, single store."""
    xv = x_ref[...]
    wv = w_ref[...]
    if compute_dtype is not None:
        xv = xv.astype(compute_dtype)
        wv = wv.astype(compute_dtype)
    acc = jnp.dot(xv, wv, preferred_element_type=jnp.float32)
    acc += b_ref[...].astype(jnp.float32)          # (1, tn) broadcasts
    o_ref[...] = acc.astype(o_ref.dtype)


def _linear_kernel_multi_k_f32(x_ref, w_ref, b_ref, o_ref, *, compute_dtype):
    """Multi-step K reduction, f32 output: accumulate into resident o_ref."""
    k = pl.program_id(2)

    @pl.when(k == 0)
    def _():
        o_ref[...] = jnp.broadcast_to(b_ref[...].astype(o_ref.dtype), o_ref.shape)

    xv = x_ref[...]
    wv = w_ref[...]
    if compute_dtype is not None:
        xv = xv.astype(compute_dtype)
        wv = wv.astype(compute_dtype)
    o_ref[...] += jnp.dot(xv, wv, preferred_element_type=jnp.float32)


def _linear_kernel_multi_k_acc(x_ref, w_ref, b_ref, o_ref, acc_ref, *, compute_dtype):
    """Multi-step K reduction, narrow output: f32 scratch accumulator + cast."""
    k = pl.program_id(2)

    @pl.when(k == 0)
    def _():
        acc_ref[...] = jnp.broadcast_to(b_ref[...].astype(jnp.float32), acc_ref.shape)

    xv = x_ref[...]
    wv = w_ref[...]
    if compute_dtype is not None:
        xv = xv.astype(compute_dtype)
        wv = wv.astype(compute_dtype)
    acc_ref[...] += jnp.dot(xv, wv, preferred_element_type=jnp.float32)

    @pl.when(k == pl.num_programs(2) - 1)
    def _():
        o_ref[...] = acc_ref[...].astype(o_ref.dtype)


# ----------------------------------------------------------------------------
# Module wrapper: y = x @ weight.T + bias   (nn.Linear.forward semantics)
# ----------------------------------------------------------------------------
class BasicExpertPallas:
    """Holds the once-padded / once-transposed parameters (do this at init)."""

    def __init__(self, weight, bias, *, compute_dtype=None):
        """weight: (N, K) PyTorch layout; bias: (N,)."""
        N, K = weight.shape
        assert bias.shape == (N,)
        self.N, self.K = int(N), int(K)
        # Set compute_dtype=jnp.bfloat16 for the bf16-native MXU on v6e/v7x
        # (f32 accumulation kept); default None keeps exact f32 math.
        self.compute_dtype = compute_dtype

        # MXU-friendly alignment: 256-granule on N/K when they exceed one
        # 128-lane tile (the v6e/v7x MXU is 2x256^2; 128-wide tiles halve util).
        self.Np = _round_up(self.N, 256) if self.N > 128 else _round_up(self.N, 128)
        self.Kp = _round_up(self.K, 256) if self.K > 128 else _round_up(self.K, 128)

        # One-time pad + transpose to (Kp, Np): no per-call weight HBM
        # round-trip, and the kernel contraction is a native MXU matmul.
        w_kn = jnp.transpose(weight)                       # (K, N)
        if (self.Kp, self.Np) != (self.K, self.N):
            w_kn = jnp.pad(w_kn, ((0, self.Kp - self.K), (0, self.Np - self.N)))
        self.w_kn = w_kn
        b2 = bias.reshape(1, self.N)
        if self.Np != self.N:
            b2 = jnp.pad(b2, ((0, 0), (0, self.Np - self.N)))
        self.b2 = b2

        cap = _vmem_capacity_bytes()
        self.vmem_budget = int(cap * 0.70)   # tile-footprint budget
        self.vmem_limit = int(cap * 0.80)    # scoped-VMEM limit passed to Mosaic
        self.tm_cap = 1024 if self.vmem_budget >= 80 * (1 << 20) else 512

    def __call__(self, x, *, tm=None, tn=None, tk=None):
        N, K, Np, Kp = self.N, self.K, self.Np, self.Kp
        assert x.shape[-1] == K, "x last dim must equal in_features"
        lead_shape = x.shape[:-1]
        xm = x.reshape(-1, K)
        M = xm.shape[0]
        out_dtype = x.dtype

        # ---- M tile: stream W exactly once when M is small ------------------
        if tm is None:
            mp8 = _round_up(max(M, 1), 8)
            tm = mp8 if mp8 <= self.tm_cap else self.tm_cap
        assert tm % 8 == 0
        Mp = _round_up(max(M, 1), tm)

        # ---- N tile ----------------------------------------------------------
        if tn is None:
            if Np <= 512:
                tn = Np
            elif Np % 512 == 0:
                tn = 512
            else:
                tn = 256
            # keep both v7x TensorCores busy on tiny-M calls
            if Mp // tm == 1 and Np // tn == 1 and Np >= 512:
                tn = Np // 2
        assert Np % tn == 0 and (tn % 128 == 0 or tn == Np)

        x_item = jnp.dtype(xm.dtype).itemsize
        w_item = jnp.dtype(self.w_kn.dtype).itemsize
        b_item = jnp.dtype(self.b2.dtype).itemsize
        o_item = jnp.dtype(out_dtype).itemsize
        acc_bytes = 0 if out_dtype == jnp.float32 else tm * tn * 4

        def _fits(tk_, needs_acc):
            fp = (2 * tm * tk_ * x_item      # x tiles (double-buffered)
                  + 2 * tk_ * tn * w_item    # W tiles
                  + 2 * tm * tn * o_item     # output tiles
                  + 2 * tn * b_item)         # bias tiles
            if needs_acc:
                fp += acc_bytes
            return fp <= self.vmem_budget

        # ---- K tile: collapse the reduction axis whenever it fits VMEM ------
        if tk is None:
            if _fits(Kp, False):
                tk = Kp
            else:
                tk = 128
                for cand in (2048, 1024, 512, 256):
                    if Kp % cand == 0 and _fits(cand, True):
                        tk = cand
                        break
        assert Kp % tk == 0 and tk % 128 == 0
        multi_k = tk != Kp

        # Per-call activation pad only (weight/bias already padded at init).
        # K-padding contributes exactly zero to the reduction.
        if (Mp, Kp) != (M, K):
            xm = jnp.pad(xm, ((0, Mp - M), (0, Kp - K)))

        grid_i, grid_j, grid_k = Mp // tm, Np // tn, Kp // tk

        cost = pl.CostEstimate(
            flops=2 * Mp * Np * Kp,
            transcendentals=0,
            bytes_accessed=(Mp * Kp * grid_j * x_item      # x re-streamed per j
                            + Kp * Np * grid_i * w_item    # W re-streamed per i
                            + Mp * Np * o_item + Np * b_item),
        )

        if not multi_k:
            grid = (grid_i, grid_j)
            in_specs = [
                pl.BlockSpec((tm, tk), lambda i, j: (i, 0)),   # x tile
                pl.BlockSpec((tk, tn), lambda i, j: (0, j)),   # W tile (K,N)
                pl.BlockSpec((1, tn), lambda i, j: (0, j)),    # bias tile
            ]
            out_specs = pl.BlockSpec((tm, tn), lambda i, j: (i, j))
            scratch = []
            kernel = functools.partial(_linear_kernel_single_k,
                                       compute_dtype=self.compute_dtype)
            dims = ("parallel", "parallel")
        else:
            grid = (grid_i, grid_j, grid_k)   # K innermost, "arbitrary"
            # TODO(synk): sweep pipeline_mode=pl.Buffered(3) on the W spec when
            # the call is weight-stream bound (grid_i == 1) and DMA is exposed.
            in_specs = [
                pl.BlockSpec((tm, tk), lambda i, j, k: (i, k)),
                pl.BlockSpec((tk, tn), lambda i, j, k: (k, j)),
                pl.BlockSpec((1, tn), lambda i, j, k: (0, j)),
            ]
            out_specs = pl.BlockSpec((tm, tn), lambda i, j, k: (i, j))
            if out_dtype == jnp.float32:
                scratch = []
                kernel = functools.partial(_linear_kernel_multi_k_f32,
                                           compute_dtype=self.compute_dtype)
            else:
                scratch = [pltpu.VMEM((tm, tn), jnp.float32)]
                kernel = functools.partial(_linear_kernel_multi_k_acc,
                                           compute_dtype=self.compute_dtype)
            dims = ("parallel", "parallel", "arbitrary")

        out = pl.pallas_call(
            kernel,
            out_shape=jax.ShapeDtypeStruct((Mp, Np), out_dtype),
            grid_spec=pltpu.PrefetchScalarGridSpec(
                num_scalar_prefetch=0,
                grid=grid,
                in_specs=in_specs,
                out_specs=out_specs,
                scratch_shapes=scratch,
            ),
            compiler_params=pltpu.CompilerParams(
                dimension_semantics=dims,
                vmem_limit_bytes=self.vmem_limit,
            ),
            cost_estimate=cost,
        )(xm, self.w_kn, self.b2)

        out = out[:M, :N]
        return out.reshape(*lead_shape, N)


def basic_expert_forward(x, weight, bias, **tile_overrides):
    """Convenience wrapper (re-pads weight per call). Prefer BasicExpertPallas."""
    return BasicExpertPallas(weight, bias)(x, **tile_overrides)


# ----------------------------------------------------------------------------
# Self-test
# ----------------------------------------------------------------------------
if __name__ == "__main__":
    key = jax.random.PRNGKey(0)

    def _make_params(k, n_in, n_out, dtype=jnp.float32):
        kw, kb = jax.random.split(k)
        bound = 1.0 / (n_in ** 0.5)
        w = jax.random.uniform(kw, (n_out, n_in), jnp.float32, -bound, bound)
        b = jax.random.uniform(kb, (n_out,), jnp.float32, -bound, bound)
        return w.astype(dtype), b.astype(dtype)

    k1, k2, k3, k4 = jax.random.split(key, 4)

    # --- case 1: toy BasicExpert shapes (in=32, out=64, x=(2,8,32)), f32 -----
    in_f, out_f = 32, 64
    w1, b1 = _make_params(k1, in_f, out_f)
    x1 = jax.random.normal(k2, (2, 8, in_f), jnp.float32)
    expert1 = BasicExpertPallas(w1, b1)          # pad/transpose W once, at init
    y1 = jax.block_until_ready(expert1(x1))      # collapsed-K (2-D grid) path
    y1_ref = x1 @ w1.T + b1
    assert y1.shape == (2, 8, out_f)
    assert jnp.allclose(y1, y1_ref, atol=1e-5, rtol=1e-5)

    # --- case 2: ragged shapes (M=51, N=192, K=640 -> padded), f32 -----------
    ka, kb_, kc = jax.random.split(k3, 3)
    in_f2, out_f2 = 640, 192                     # Kp=768, Np=256
    w2, b2 = _make_params(ka, in_f2, out_f2)
    x2 = jax.random.normal(kb_, (3, 17, in_f2), jnp.float32)
    expert2 = BasicExpertPallas(w2, b2)
    y2 = jax.block_until_ready(expert2(x2, tk=256))   # forced 3-step K reduction
    y2_ref = x2 @ w2.T + b2
    assert y2.shape == (3, 17, out_f2)
    assert jnp.allclose(y2, y2_ref, atol=1e-4, rtol=1e-4)
    y2b = jax.block_until_ready(expert2(x2))          # auto tiles: collapsed K
    assert jnp.allclose(y2b, y2_ref, atol=1e-4, rtol=1e-4)

    # --- case 3: bf16 in/out, forced multi-K -> f32 scratch accumulator ------
    in_f3, out_f3 = 256, 128
    w3, b3 = _make_params(kc, in_f3, out_f3, dtype=jnp.bfloat16)
    x3 = jax.random.normal(k4, (2, 8, in_f3), jnp.float32).astype(jnp.bfloat16)
    expert3 = BasicExpertPallas(w3, b3)
    y3 = jax.block_until_ready(expert3(x3, tk=128))   # 2 K-steps
    y3_ref = (x3.astype(jnp.float32) @ w3.astype(jnp.float32).T
              + b3.astype(jnp.float32))
    assert y3.dtype == jnp.bfloat16
    assert jnp.allclose(y3.astype(jnp.float32), y3_ref, atol=1e-1, rtol=1e-1)

    print("KERNEL_OK")
</pallas_src>

<mosaic_0001>
module attributes {stable_mosaic.version = 11 : i64} {
  func.func @_linear_kernel_single_k(%arg0: i32, %arg1: i32, %arg2: memref<16x128xf32, #tpu.memory_space<vmem>>, %arg3: memref<128x128xf32, #tpu.memory_space<vmem>>, %arg4: memref<1x128xf32, #tpu.memory_space<vmem>>, %arg5: memref<16x128xf32, #tpu.memory_space<vmem>>) attributes {dimension_semantics = [#tpu.dimension_semantics<parallel>, #tpu.dimension_semantics<parallel>], iteration_bounds = array<i64: 1, 1>, scalar_prefetch = 0 : i64, scratch_operands = 0 : i64, tpu.core_type = #tpu.core_type<tc>, window_params = [{transform_indices = @transform_0, window_bounds = array<i64: 16, 128>}, {transform_indices = @transform_1, window_bounds = array<i64: 128, 128>}, {transform_indices = @transform_2, window_bounds = array<i64: 1, 128>}, {transform_indices = @transform_3, window_bounds = array<i64: 16, 128>}]} {
    %c0 = arith.constant 0 : index
    %c0_0 = arith.constant 0 : index
    %0 = vector.load %arg2[%c0, %c0_0] : memref<16x128xf32, #tpu.memory_space<vmem>>, vector<16x128xf32>
    %c0_1 = arith.constant 0 : index
    %c0_2 = arith.constant 0 : index
    %1 = vector.load %arg3[%c0_1, %c0_2] : memref<128x128xf32, #tpu.memory_space<vmem>>, vector<128x128xf32>
    %cst = arith.constant dense<0.000000e+00> : vector<16x128xf32>
    %2 = tpu.matmul %0, %1, %cst {dimension_numbers = #tpu.dot_dimension_numbers<[1], [0], [0], [1], [0, 0, 1, 1], [], []>} : vector<16x128xf32>, vector<128x128xf32>, vector<16x128xf32> -> vector<16x128xf32>
    %c0_3 = arith.constant 0 : index
    %c0_4 = arith.constant 0 : index
    %3 = vector.load %arg4[%c0_3, %c0_4] : memref<1x128xf32, #tpu.memory_space<vmem>>, vector<1x128xf32>
    %4 = vector.broadcast %3 : vector<1x128xf32> to vector<16x128xf32>
    %5 = arith.addf %2, %4 : vector<16x128xf32>
    %c0_5 = arith.constant 0 : index
    %c0_6 = arith.constant 0 : index
    %6 = vector.load %arg5[%c0_5, %c0_6] : memref<16x128xf32, #tpu.memory_space<vmem>>, vector<16x128xf32>
    tpu.vector_store %arg5[%c0_5, %c0_6], %5 {strides = array<i32>} : memref<16x128xf32, #tpu.memory_space<vmem>>, vector<16x128xf32>,
    return
  }
  func.func @transform_0(%arg0: i32, %arg1: i32) -> (i32, i32) {
    %c0_i32 = arith.constant 0 : i32
    %c0_i32_0 = arith.constant 0 : i32
    return %arg0, %c0_i32 : i32, i32
  }
  func.func @transform_1(%arg0: i32, %arg1: i32) -> (i32, i32) {
    %c0_i32 = arith.constant 0 : i32
    %c0_i32_0 = arith.constant 0 : i32
    return %c0_i32, %arg1 : i32, i32
  }
  func.func @transform_2(%arg0: i32, %arg1: i32) -> (i32, i32) {
    %c0_i32 = arith.constant 0 : i32
    %c0_i32_0 = arith.constant 0 : i32
    return %c0_i32, %arg1 : i32, i32
  }
  func.func @transform_3(%arg0: i32, %arg1: i32) -> (i32, i32) {
    %c0_i32 = arith.constant 0 : i32
    return %arg0, %arg1 : i32, i32
  }
}

</mosaic_0001>

<bundles_post_ra>
// kernel: tpu_custom_call.1
= control target key start
LH: loop header
LB: loop body
LE: loop exit
PB: predicated region body
PF: predicated region fallthrough
CT: control target
= control target key end

     0   :  { %8 = vsyncpa [#allocation3], 0  ;;  %s399_s0 = inlined_call_operand.hbm [shape: f32[16,128], index: 0, kind: input, shape index: {}]   ;;  %s400_s1 = inlined_call_operand.hbm [shape: f32[128,128], index: 1, kind: input, shape index: {}]   ;;  %s401_s2 = inlined_call_operand.vmem [shape: f32[1,128], index: 2, kind: input, shape index: {}]   ;;  %s402_s3 = inlined_call_operand.hbm [shape: f32[16,128], index: 3, kind: output, shape index: {}]  }
   0x1   :  { %9 = vsyncpa [#allocation6], 0 }
   0x2   :  { %10 = vsyncpa [#allocation4], 0  ;;  %s326_s12 = smov [#allocation2]   ;;  %s254_s16 = scalar_lea.hbm %s399_s0, 256 }
   0x3   :  { %s16_s13 = sshll.u32 %s326_s12, 4  ;;  %p255_p0 = scmp.ne.s32.totalorder %s399_s0, %s254_s16  ;;  %s17_s13 = int_to_ptr.vmem [resolvable:$true] %s16_s13 }
   0x4   :  { %p258_p1 = scmp.lt.u32.totalorder %s254_s16, %s399_s0 }
   0x6   :  { %p260_p2 = pnand %p258_p1, %p255_p0 }
   0x8   :  { %263 = shalt.err (!%p260_p2)
}
   0x9   :  { %s264_s21 = scalar_lea.vmem %s17_s13, 256  ;;  %p269_p4 = scmp.lt.s32.totalorder %s17_s13, %s17_s13 }
   0xa   :  { %p265_p3 = scmp.ne.s32.totalorder %s17_s13, %s264_s21  ;;  %p270_p5 = scmp.lt.s32.totalorder %s264_s21, %s264_s21 }
   0xc   :  { %p271_p6 = por %p270_p5, %p269_p4 }
   0xe   :  { %p272_p7 = pnand %p271_p6, %p265_p3 }
  0x10   :  { %275 = shalt.err (!%p272_p7)
}
  0x11   :  { %s327_s22 = smov 128   ;;  %s328_s23 = smov 8  }
  0x12   :  { %22 = dma.hbm_to_vmem [thread:$0]  %s399_s0, 256, %s17_s13, [#allocation3], %s327_s22, %s327_s22, %s328_s23  }
  0x13   :  { %s329_s26 = smov [#allocation5]   ;;  %s276_s30 = scalar_lea.hbm %s400_s1, 2048 }
  0x14   :  { %s28_s27 = sshll.u32 %s329_s26, 4  ;;  %p277_p8 = scmp.ne.s32.totalorder %s400_s1, %s276_s30  ;;  %s29_s27 = int_to_ptr.vmem [resolvable:$true] %s28_s27 }
  0x15   :  { %p280_p9 = scmp.lt.u32.totalorder %s276_s30, %s400_s1 }
  0x17   :  { %p282_p10 = pnand %p280_p9, %p277_p8 }
  0x19   :  { %285 = shalt.err (!%p282_p10)
}
  0x1a   :  { %s286_s8 = scalar_lea.vmem %s29_s27, 2048  ;;  %p291_p12 = scmp.lt.s32.totalorder %s29_s27, %s29_s27 }
  0x1b   :  { %p287_p11 = scmp.ne.s32.totalorder %s29_s27, %s286_s8  ;;  %p292_p13 = scmp.lt.s32.totalorder %s286_s8, %s286_s8 }
  0x1d   :  { %p293_p0 = por %p292_p13, %p291_p12 }
  0x1f   :  { %p294_p1 = pnand %p293_p0, %p287_p11 }
  0x21   :  { %297 = shalt.err (!%p294_p1)
}
  0x22   :  { %34 = dma.hbm_to_vmem [thread:$0]  %s400_s1, 2048, %s29_s27, [#allocation6], %s327_s22, %s327_s22, %s328_s23  }
  0x23   :  { %320 = dma.done.wait [#allocation3], 256  }
  0x24   :  { %321 = vsyncadd [#allocation3], 4294967040 }
  0x25   :  { %322 = dma.done.wait [#allocation6], 2048  }
  0x26   :  { %323 = vsyncadd [#allocation6], 4294965248  ;;  %v45_v0 = vld [vmem:[#allocation5] sm:$0xff]  ;;  %v46_v1 = vld [vmem:[#allocation5 + $0x8] sm:$0xff]  ;;  %s330_s11 = smov [#allocation7]  }
  0x27   :  { %v47_v2 = vld [vmem:[#allocation5 + $0x10] sm:$0xff]  ;;  %v217_v3 = vpack.c.bf16 %v46_v1, %v45_v0  ;;  %v48_v4 = vld [vmem:[#allocation5 + $0x18] sm:$0xff]  ;;  %v49_v6 = vld [vmem:[#allocation5 + $0x20] sm:$0xff]  ;;  %s150_s12 = sshll.u32 %s330_s11, 4  ;;  %s151_s12 = int_to_ptr.vmem [resolvable:$true] %s150_s12 }
  0x28   :  { %v221_v5 = vpack.c.bf16 %v48_v4, %v47_v2  ;;  %v50_v7 = vld [vmem:[#allocation5 + $0x28] sm:$0xff]  ;;  %v43_v9 = vld [vmem:[#allocation2] sm:$0xff]  ;;  %v52_v11 = vld [vmem:[#allocation5 + $0x38] sm:$0xff]  ;;  %s298_s13 = scalar_lea.vmem %s151_s12, 256  ;;  %p303_p3 = scmp.lt.s32.totalorder %s151_s12, %s151_s12 }
  0x29   :  { %218 = vmatprep.subr.bf16.mxu0 %v217_v3  ;;  %v225_v8 = vpack.c.bf16 %v50_v7, %v49_v6  ;;  %v51_v10 = vld [vmem:[#allocation5 + $0x30] sm:$0xff]  ;;  %214 = vmatprep.mubr.f32.mxu0 %v43_v9  ;;  %v53_v13 = vld [vmem:[#allocation5 + $0x40] sm:$0xff]  ;;  %v54_v14 = vld [vmem:[#allocation5 + $0x48] sm:$0xff]  ;;  %p299_p2 = scmp.ne.s32.totalorder %s151_s12, %s298_s13  ;;  %p304_p4 = scmp.lt.s32.totalorder %s298_s13, %s298_s13 }
  0x2a   :  { %220 = vmatpush3.bf16.msra.mxu0 %v217_v3  ;;  %v229_v12 = vpack.c.bf16 %v52_v11, %v51_v10  ;;  %v233_v15 = vpack.c.bf16 %v54_v14, %v53_v13  ;;  %v55_v16 = vld [vmem:[#allocation5 + $0x50] sm:$0xff]  ;;  %v56_v17 = vld [vmem:[#allocation5 + $0x58] sm:$0xff]  ;;  %v57_v19 = vld [vmem:[#allocation5 + $0x60] sm:$0xff] }
  0x2b   :  { %222 = vmatprep.subr.bf16.mxu0 %v221_v5  ;;  %v237_v18 = vpack.c.bf16 %v56_v17, %v55_v16  ;;  %v58_v20 = vld [vmem:[#allocation5 + $0x68] sm:$0xff]  ;;  %v59_v22 = vld [vmem:[#allocation5 + $0x70] sm:$0xff]  ;;  %v60_v23 = vld [vmem:[#allocation5 + $0x78] sm:$0xff]  ;;  %p305_p5 = por %p304_p4, %p303_p3 }
  0x2c   :  { %v241_v21 = vpack.c.bf16 %v58_v20, %v57_v19  ;;  %v245_v24 = vpack.c.bf16 %v60_v23, %v59_v22  ;;  %v44_v25 = vld [vmem:[#allocation2 + $0x8] sm:$0xff]  ;;  %v163_v26 = vld [vmem:[%s401_s2] ss:$0 sm:$0xff] }
  0x2d   :  { %p306_p6 = pnand %p305_p5, %p299_p2 }
  0x2e   :  { %224 = vmatpush3.bf16.msra.mxu0 %v221_v5 }
  0x2f   :  { %226 = vmatprep.subr.bf16.mxu0 %v225_v8 }
  0x32   :  { %228 = vmatpush3.bf16.msra.mxu0 %v225_v8 }
  0x33   :  { %230 = vmatprep.subr.bf16.mxu0 %v229_v12 }
  0x36   :  { %232 = vmatpush3.bf16.msra.mxu0 %v229_v12 }
  0x37   :  { %234 = vmatprep.subr.bf16.mxu0 %v233_v15 }
  0x3a   :  { %236 = vmatpush3.bf16.msra.mxu0 %v233_v15 }
  0x3b   :  { %238 = vmatprep.subr.bf16.mxu0 %v237_v18 }
  0x3e   :  { %240 = vmatpush3.bf16.msra.mxu0 %v237_v18 }
  0x3f   :  { %242 = vmatprep.subr.bf16.mxu0 %v241_v21 }
  0x42   :  { %244 = vmatpush3.bf16.msra.mxu0 %v241_v21 }
  0x43   :  { %246 = vmatprep.subr.bf16.mxu0 %v245_v24 }
  0x46   :  { %248 = vmatpush3.bf16.msra.mxu0 %v245_v24 }
  0x49   :  { %215 = vmatmul.mubr.f32.vlgmr.msra.gmra.mrb[0].mxu0 %v44_v25 }
 0x11c   :  { %v216_v27 = vpop.f32.mrb[0].mxu0 }
 0x11d   :  { %v140_v28 = vadd.f32 %v216_v27, %v163_v26  ;;  %v134_v29 = vpop.f32.mrb[1].mxu0 }
 0x11e   :  { %v135_v30 = vadd.f32 %v163_v26, %v134_v29 }
 0x11f   :  { %144 = vst [vmem:[#allocation7 + $0x8] sm:$0xff] %v140_v28 }
 0x120   :  { %143 = vst [vmem:[#allocation7] sm:$0xff] %v135_v30 }
 0x121   :  { %309 = shalt.err (!%p306_p6)
}
 0x122   :  { %s310_s2 = scalar_lea.hbm %s402_s3, 256 }
 0x123   :  { %p311_p7 = scmp.ne.s32.totalorder %s402_s3, %s310_s2  ;;  %p314_p8 = scmp.lt.u32.totalorder %s310_s2, %s402_s3 }
 0x125   :  { %p316_p9 = pnand %p314_p8, %p311_p7 }
 0x127   :  { %319 = shalt.err (!%p316_p9)
}
 0x128   :  { %156 = dma.vmem_to_hbm [thread:$0]  %s151_s12, 256, %s402_s3, [#allocation4], %s327_s22, %s327_s22, %s328_s23  }
 0x129   :  { %324 = dma.done.wait [#allocation4], 256  }
 0x12a   :  { %325 = vsyncadd [#allocation4], 4294967040 }
 0x12b   :  { %160 = vsyncpa [#allocation3], 1 }
 0x12c   :  { %161 = vsyncpa [#allocation6], 1 }
 0x12d   :  { %162 = vsyncpa [#allocation4], 1 }

</bundles_post_ra>
